<compile_context>
chip_gen: v6e
topology: v6e:2x2x1
jax: 0.10.0
libtpu: 0.0.40
codegen_flags: <defaults>
</compile_context>

<pallas_src>
import functools
import math

import jax
import jax.numpy as jnp
from jax.experimental import pallas as pl
from jax.experimental.pallas import tpu as pltpu

LANE = 128  # TPU lane width: output slabs are kept 128-lane dense.


def _round_up(x, m):
    return ((x + m - 1) // m) * m


def _linear_kernel(x_ref, w_ref, b_ref, o_ref):
    # x_ref: (TM, G*D), w_ref: (G*D, n_lanes) block-diagonal, b_ref: (1, n_lanes),
    # o_ref: (TM, n_lanes).  f32 MXU accumulation, f32 bias add, cast on store.
    acc = jnp.dot(x_ref[...], w_ref[...], preferred_element_type=jnp.float32)
    o_ref[...] = (acc + b_ref[...]).astype(o_ref.dtype)


def prepare_generator_params(weight, bias):
    """One-time prep (do at init, not per forward call).

    weight: (out_size, d_model) in PyTorch layout; bias: (out_size,).

    Builds a block-diagonal weight so that G = 128 // out_pad logical rows are
    computed per 128-lane output slab (out_pad is a power of two >= out_size,
    so it divides 128 and stores stay lane-dense).  If out_size is too wide to
    pack (> 64 lanes after padding), falls back to G=1 with a 128-multiple pad.

    Returns (w_blk, b_blk, G, out_pad):
      w_blk: (G * d_model, G * out_pad)   = kron(I_G, W.T zero-padded)
      b_blk: (1, G * out_pad)             = bias zero-padded, tiled G times
    For bf16 I/O on v6e/v7x, pass bf16 weight/bias here (accum stays f32).
    """
    out_size, d_model = weight.shape
    out_pad = max(8, 1 << (out_size - 1).bit_length())  # pow2 >= out_size, >= 8
    if out_pad <= LANE // 2:
        G = LANE // out_pad
    else:
        out_pad = _round_up(out_size, LANE)
        G = 1

    w_t = jnp.zeros((d_model, out_pad), weight.dtype).at[:, :out_size].set(weight.T)
    # Block-diagonal: block g maps input segment g -> output lanes [g*out_pad, ...)
    w_blk = jnp.kron(jnp.eye(G, dtype=weight.dtype), w_t)
    b_pad = jnp.zeros((out_pad,), bias.dtype).at[:out_size].set(bias)
    b_blk = jnp.tile(b_pad, (G,)).reshape(1, G * out_pad)
    return w_blk, b_blk, G, out_pad


@functools.partial(
    jax.jit, static_argnames=("out_size", "group", "out_pad", "tm", "io_dtype")
)
def generator_forward(x, w_blk, b_blk, out_size, group, out_pad, tm=2048,
                      io_dtype=None):
    """Generator.forward: returns x @ W.T + b with shape (B, S, out_size).

    x: (B, S, d_model); w_blk/b_blk/group/out_pad from prepare_generator_params.
    tm is the row tile in *packed* rows (each packed row = `group` logical rows).
    io_dtype=jnp.bfloat16 on v6e/v7x halves HBM traffic (accum stays f32).
    """
    B, S, D = x.shape
    G = group
    n_lanes = w_blk.shape[1]
    M = B * S

    if io_dtype is not None and x.dtype != io_dtype:
        x = x.astype(io_dtype)

    x2d = x.reshape(M, D)
    # Pad only up to a multiple of G (< G rows, rare; NOT a pad to tile size).
    m_g = _round_up(M, G)
    if m_g != M:
        x2d = jnp.pad(x2d, ((0, m_g - M), (0, 0)))
    m_packed = m_g // G
    x_packed = x2d.reshape(m_packed, G * D)  # contiguous reshape: free

    # Tile selection: cap at `tm`, but keep >= ~8 grid steps on large problems
    # so the "parallel" axis splits across v7x's 2 TCs with pipelining on each;
    # tiny problems use a single full-extent block (satisfies the (8,128) rule).
    tm_eff = min(tm, _round_up(max(m_packed // 8, 1), 8))
    if tm_eff >= m_packed:
        tm_eff = m_packed
    grid_m = pl.cdiv(m_packed, tm_eff)

    out_packed = pl.pallas_call(
        _linear_kernel,
        out_shape=jax.ShapeDtypeStruct((m_packed, n_lanes), x.dtype),
        grid=(grid_m,),
        in_specs=[
            pl.BlockSpec((tm_eff, G * D), lambda i: (i, 0)),   # packed x rows
            pl.BlockSpec((G * D, n_lanes), lambda i: (0, 0)),  # block-diag W (invariant)
            pl.BlockSpec((1, n_lanes), lambda i: (0, 0)),      # bias (invariant)
        ],
        out_specs=pl.BlockSpec((tm_eff, n_lanes), lambda i: (i, 0)),
        compiler_params=pltpu.CompilerParams(
            # Rows are independent: shard the packed-row axis across TensorCores.
            dimension_semantics=("parallel",),
            vmem_limit_bytes=32 * 1024 * 1024,
        ),
    )(x_packed, w_blk, b_blk)

    # Free reshape back to one logical row per line, then cheap narrow slice
    # (out_pad lanes/row, not a 128-lane slab like before).
    out = out_packed.reshape(m_g, out_pad)[:M, :out_size]
    return out.reshape(B, S, out_size)


def init_generator_params(key, d_model, out_size, dtype=jnp.float32):
    """Deterministic init matching nn.Linear's default U(-1/sqrt(fan_in), .)."""
    kw, kb = jax.random.split(key)
    bound = 1.0 / math.sqrt(d_model)
    weight = jax.random.uniform(kw, (out_size, d_model), dtype, -bound, bound)
    bias = jax.random.uniform(kb, (out_size,), dtype, -bound, bound)
    return weight, bias


if __name__ == "__main__":
    # Small shapes consistent with the transformer Generator: batch=2, seq=8,
    # d_model=32, out_size=3 (individual_TF predicts (x, y, logvar)-style outputs).
    B, S, D, OUT = 2, 8, 32, 3

    key = jax.random.PRNGKey(0)
    kx, kp = jax.random.split(key)
    x = jax.random.normal(kx, (B, S, D), dtype=jnp.float32)
    weight, bias = init_generator_params(kp, D, OUT)

    # One-time param prep (block-diagonal packing), then forward.
    w_blk, b_blk, G, out_pad = prepare_generator_params(weight, bias)
    y = generator_forward(x, w_blk, b_blk, OUT, G, out_pad)
    y = jax.block_until_ready(y)

    # Sanity check against plain-JAX reference of x @ W.T + b.
    ref = x @ weight.T + bias
    assert y.shape == (B, S, OUT)
    assert jnp.allclose(y, ref, atol=1e-5, rtol=1e-5)

    print("KERNEL_OK")
</pallas_src>

<mosaic_0001>
module attributes {stable_mosaic.version = 11 : i64} {
  func.func @_linear_kernel(%arg0: i32, %arg1: memref<1x512xf32, #tpu.memory_space<vmem>>, %arg2: memref<512x128xf32, #tpu.memory_space<vmem>>, %arg3: memref<1x128xf32, #tpu.memory_space<vmem>>, %arg4: memref<1x128xf32, #tpu.memory_space<vmem>>) attributes {dimension_semantics = [#tpu.dimension_semantics<parallel>], iteration_bounds = array<i64: 1>, scalar_prefetch = 0 : i64, scratch_operands = 0 : i64, tpu.core_type = #tpu.core_type<tc>, window_params = [{transform_indices = @transform_0, window_bounds = array<i64: 1, 512>}, {pipeline_mode = #tpu.pipeline_mode<synchronous>, transform_indices = @transform_1, window_bounds = array<i64: 512, 128>}, {pipeline_mode = #tpu.pipeline_mode<synchronous>, transform_indices = @transform_2, window_bounds = array<i64: 1, 128>}, {transform_indices = @transform_3, window_bounds = array<i64: 1, 128>}]} {
    %c0 = arith.constant 0 : index
    %c0_0 = arith.constant 0 : index
    %0 = vector.load %arg1[%c0, %c0_0] : memref<1x512xf32, #tpu.memory_space<vmem>>, vector<1x512xf32>
    %c0_1 = arith.constant 0 : index
    %c0_2 = arith.constant 0 : index
    %1 = vector.load %arg2[%c0_1, %c0_2] : memref<512x128xf32, #tpu.memory_space<vmem>>, vector<512x128xf32>
    %cst = arith.constant dense<0.000000e+00> : vector<1x128xf32>
    %2 = tpu.matmul %0, %1, %cst {dimension_numbers = #tpu.dot_dimension_numbers<[1], [0], [0], [1], [0, 0, 1, 1], [], []>} : vector<1x512xf32>, vector<512x128xf32>, vector<1x128xf32> -> vector<1x128xf32>
    %c0_3 = arith.constant 0 : index
    %c0_4 = arith.constant 0 : index
    %3 = vector.load %arg3[%c0_3, %c0_4] : memref<1x128xf32, #tpu.memory_space<vmem>>, vector<1x128xf32>
    %4 = arith.addf %2, %3 : vector<1x128xf32>
    %c0_5 = arith.constant 0 : index
    %c0_6 = arith.constant 0 : index
    %5 = vector.load %arg4[%c0_5, %c0_6] : memref<1x128xf32, #tpu.memory_space<vmem>>, vector<1x128xf32>
    tpu.vector_store %arg4[%c0_5, %c0_6], %4 {strides = array<i32>} : memref<1x128xf32, #tpu.memory_space<vmem>>, vector<1x128xf32>,
    return
  }
  func.func @transform_0(%arg0: i32) -> (i32, i32) {
    %c0_i32 = arith.constant 0 : i32
    %c0_i32_0 = arith.constant 0 : i32
    return %arg0, %c0_i32 : i32, i32
  }
  func.func @transform_1(%arg0: i32) -> (i32, i32) {
    %c0_i32 = arith.constant 0 : i32
    %c0_i32_0 = arith.constant 0 : i32
    %c0_i32_1 = arith.constant 0 : i32
    return %c0_i32, %c0_i32_0 : i32, i32
  }
  func.func @transform_2(%arg0: i32) -> (i32, i32) {
    %c0_i32 = arith.constant 0 : i32
    %c0_i32_0 = arith.constant 0 : i32
    %c0_i32_1 = arith.constant 0 : i32
    return %c0_i32, %c0_i32_0 : i32, i32
  }
  func.func @transform_3(%arg0: i32) -> (i32, i32) {
    %c0_i32 = arith.constant 0 : i32
    %c0_i32_0 = arith.constant 0 : i32
    return %arg0, %c0_i32 : i32, i32
  }
}

</mosaic_0001>

<bundles_post_ra>
// kernel: generator_forward.1
= control target key start
LH: loop header
LB: loop body
LE: loop exit
PB: predicated region body
PF: predicated region fallthrough
CT: control target
= control target key end

     0   :  { %8 = vsyncpa [#allocation3], 0  ;;  %s356_s12 = smov [#allocation2]   ;;  %s391_s0 = inlined_call_operand.vmem [shape: f32[1,512], index: 0, kind: input, shape index: {}]   ;;  %s392_s1 = inlined_call_operand.hbm [shape: f32[512,128], index: 1, kind: input, shape index: {}]   ;;  %s393_s2 = inlined_call_operand.vmem [shape: f32[1,128], index: 2, kind: input, shape index: {}]   ;;  %s394_s3 = inlined_call_operand.vmem [shape: f32[1,128], index: 3, kind: output, shape index: {}]  }
   0x1   :  { %s16_s13 = sshll.u32 %s356_s12, 4  ;;  %s17_s13 = int_to_ptr.vmem [resolvable:$true] %s16_s13 }
   0x2   :  { %s342_s14 = scalar_lea.vmem %s17_s13, 8192  ;;  %p347_p1 = scmp.lt.s32.totalorder %s17_s13, %s17_s13 }
   0x3   :  { %p343_p0 = scmp.ne.s32.totalorder %s17_s13, %s342_s14  ;;  %p348_p2 = scmp.lt.s32.totalorder %s342_s14, %s342_s14 }
   0x5   :  { %p349_p3 = por %p348_p2, %p347_p1 }
   0x7   :  { %p350_p4 = pnand %p349_p3, %p343_p0 }
   0x9   :  { %353 = shalt.err (!%p350_p4)
}
   0xa   :  { %s357_s15 = smov 128   ;;  %s358_s16 = smov 8  }
   0xb   :  { %22 = dma.hbm_to_vmem [thread:$0]  %s392_s1, 8192, %s17_s13, [#allocation3], %s357_s15, %s357_s15, %s358_s16  }
   0xc   :  { %354 = dma.done.wait [#allocation3], 8192  }
   0xd   :  { %355 = vsyncadd [#allocation3], 4294959104  ;;  %v60_v0 = vld [vmem:[#allocation2 + $0xf8] sm:$0xff]  ;;  %v59_v4 = vld [vmem:[#allocation2 + $0xf0] sm:$0xff]  ;;  %v95_v38 = vlaneseq }
   0xe   :  { %v92_v1 = vld [vmem:[#allocation2 + $0x1f8] sm:$0xff]  ;;  %261 = vmatprep.subr.mxu0 %v60_v0  ;;  %v91_v5 = vld [vmem:[#allocation2 + $0x1f0] sm:$0xff]  ;;  %v58_v8 = vld [vmem:[#allocation2 + $0xe8] sm:$0xff] }
   0xf   :  { %v44_v2 = vld [vmem:[#allocation2 + $0x78] sm:$0xff]  ;;  %296 = vmatprep.subr.mxu1 %v92_v1  ;;  %v43_v6 = vld [vmem:[#allocation2 + $0x70] sm:$0xff]  ;;  %v90_v9 = vld [vmem:[#allocation2 + $0x1e8] sm:$0xff]  ;;  %v96_v47 = vshrl.u32 %v95_v38, 7 }
  0x10   :  { %v76_v3 = vld [vmem:[#allocation2 + $0x178] sm:$0xff]  ;;  %262 = vmatpush3.msra.mxu0 %v44_v2  ;;  %v75_v7 = vld [vmem:[#allocation2 + $0x170] sm:$0xff]  ;;  %v42_v10 = vld [vmem:[#allocation2 + $0x68] sm:$0xff] }
  0x11   :  { %297 = vmatpush3.msra.mxu1 %v76_v3  ;;  %263 = vmatprep.subr.mxu0 %v59_v4  ;;  %v74_v11 = vld [vmem:[#allocation2 + $0x168] sm:$0xff]  ;;  %v57_v12 = vld [vmem:[#allocation2 + $0xe0] sm:$0xff]  ;;  %v56_v16 = vld [vmem:[#allocation2 + $0xd8] sm:$0xff]  ;;  %v101_v56 = vsub.s32 1, %v96_v47  ;;  %v109_v60 = vsub.s32 3, %v96_v47  ;;  %v97_v63 = vsub.s32 0, %v96_v47 }
  0x12   :  { %298 = vmatprep.subr.mxu1 %v91_v5  ;;  %264 = vmatpush3.msra.mxu0 %v43_v6  ;;  %v89_v13 = vld [vmem:[#allocation2 + $0x1e0] sm:$0xff]  ;;  %v88_v17 = vld [vmem:[#allocation2 + $0x1d8] sm:$0xff]  ;;  %v55_v20 = vld [vmem:[#allocation2 + $0xd0] sm:$0xff]  ;;  %v105_v0 = vsub.s32 2, %v96_v47 }
  0x13   :  { %299 = vmatpush3.msra.mxu1 %v75_v7  ;;  %265 = vmatprep.subr.mxu0 %v58_v8  ;;  %v41_v14 = vld [vmem:[#allocation2 + $0x60] sm:$0xff]  ;;  %v40_v18 = vld [vmem:[#allocation2 + $0x58] sm:$0xff]  ;;  %v87_v21 = vld [vmem:[#allocation2 + $0x1d0] sm:$0xff] }
  0x14   :  { %300 = vmatprep.subr.mxu1 %v90_v9  ;;  %v73_v15 = vld [vmem:[#allocation2 + $0x160] sm:$0xff]  ;;  %266 = vmatpush3.msra.mxu0 %v42_v10  ;;  %v72_v19 = vld [vmem:[#allocation2 + $0x158] sm:$0xff]  ;;  %v39_v22 = vld [vmem:[#allocation2 + $0x50] sm:$0xff] }
  0x15   :  { %301 = vmatpush3.msra.mxu1 %v74_v11  ;;  %267 = vmatprep.subr.mxu0 %v57_v12  ;;  %v71_v23 = vld [vmem:[#allocation2 + $0x150] sm:$0xff]  ;;  %v54_v24 = vld [vmem:[#allocation2 + $0xc8] sm:$0xff]  ;;  %v53_v28 = vld [vmem:[#allocation2 + $0xc0] sm:$0xff] }
  0x16   :  { %302 = vmatprep.subr.mxu1 %v89_v13  ;;  %268 = vmatpush3.msra.mxu0 %v41_v14  ;;  %v86_v25 = vld [vmem:[#allocation2 + $0x1c8] sm:$0xff]  ;;  %v85_v29 = vld [vmem:[#allocation2 + $0x1c0] sm:$0xff]  ;;  %v52_v32 = vld [vmem:[#allocation2 + $0xb8] sm:$0xff] }
  0x17   :  { %303 = vmatpush3.msra.mxu1 %v73_v15  ;;  %269 = vmatprep.subr.mxu0 %v56_v16  ;;  %v38_v26 = vld [vmem:[#allocation2 + $0x48] sm:$0xff]  ;;  %v37_v30 = vld [vmem:[#allocation2 + $0x40] sm:$0xff]  ;;  %v84_v33 = vld [vmem:[#allocation2 + $0x1b8] sm:$0xff] }
  0x18   :  { %304 = vmatprep.subr.mxu1 %v88_v17  ;;  %270 = vmatpush3.msra.mxu0 %v40_v18  ;;  %v70_v27 = vld [vmem:[#allocation2 + $0x148] sm:$0xff]  ;;  %v69_v31 = vld [vmem:[#allocation2 + $0x140] sm:$0xff]  ;;  %v36_v34 = vld [vmem:[#allocation2 + $0x38] sm:$0xff] }
  0x19   :  { %305 = vmatpush3.msra.mxu1 %v72_v19  ;;  %271 = vmatprep.subr.mxu0 %v55_v20  ;;  %v68_v35 = vld [vmem:[#allocation2 + $0x138] sm:$0xff]  ;;  %v51_v36 = vld [vmem:[#allocation2 + $0xb0] sm:$0xff]  ;;  %v50_v41 = vld [vmem:[#allocation2 + $0xa8] sm:$0xff] }
  0x1a   :  { %306 = vmatprep.subr.mxu1 %v87_v21  ;;  %272 = vmatpush3.msra.mxu0 %v39_v22  ;;  %v83_v37 = vld [vmem:[#allocation2 + $0x1b0] sm:$0xff]  ;;  %v82_v42 = vld [vmem:[#allocation2 + $0x1a8] sm:$0xff]  ;;  %v49_v45 = vld [vmem:[#allocation2 + $0xa0] sm:$0xff] }
  0x1b   :  { %307 = vmatpush3.msra.mxu1 %v71_v23  ;;  %273 = vmatprep.subr.mxu0 %v54_v24  ;;  %v35_v39 = vld [vmem:[#allocation2 + $0x30] sm:$0xff]  ;;  %v34_v43 = vld [vmem:[#allocation2 + $0x28] sm:$0xff]  ;;  %v81_v46 = vld [vmem:[#allocation2 + $0x1a0] sm:$0xff] }
  0x1c   :  { %308 = vmatprep.subr.mxu1 %v86_v25  ;;  %274 = vmatpush3.msra.mxu0 %v38_v26  ;;  %v67_v40 = vld [vmem:[#allocation2 + $0x130] sm:$0xff]  ;;  %v66_v44 = vld [vmem:[#allocation2 + $0x128] sm:$0xff]  ;;  %v33_v48 = vld [vmem:[#allocation2 + $0x20] sm:$0xff] }
  0x1d   :  { %309 = vmatpush3.msra.mxu1 %v70_v27  ;;  %275 = vmatprep.subr.mxu0 %v53_v28  ;;  %v65_v49 = vld [vmem:[#allocation2 + $0x120] sm:$0xff]  ;;  %v48_v50 = vld [vmem:[#allocation2 + $0x98] sm:$0xff]  ;;  %v47_v54 = vld [vmem:[#allocation2 + $0x90] sm:$0xff] }
  0x1e   :  { %310 = vmatprep.subr.mxu1 %v85_v29  ;;  %276 = vmatpush3.msra.mxu0 %v37_v30  ;;  %v80_v51 = vld [vmem:[#allocation2 + $0x198] sm:$0xff]  ;;  %v79_v55 = vld [vmem:[#allocation2 + $0x190] sm:$0xff]  ;;  %v28_v59 = vld [vmem:[%s391_s0] sm:$0xf] }
  0x1f   :  { %311 = vmatpush3.msra.mxu1 %v69_v31  ;;  %277 = vmatprep.subr.mxu0 %v52_v32  ;;  %v32_v52 = vld [vmem:[#allocation2 + $0x18] sm:$0xff]  ;;  %v31_v57 = vld [vmem:[#allocation2 + $0x10] sm:$0xff]  ;;  %v46_v61 = vld [vmem:[#allocation2 + $0x88] sm:$0xff]  ;;  %v102_v5 = vrot.slane %v28_v59, %v101_v56  ;;  %v110_v7 = vrot.slane %v28_v59, %v109_v60  ;;  %v98_v9 = vrot.slane %v28_v59, %v97_v63 }
  0x20   :  { %312 = vmatprep.subr.mxu1 %v84_v33  ;;  %278 = vmatpush3.msra.mxu0 %v36_v34  ;;  %v64_v53 = vld [vmem:[#allocation2 + $0x118] sm:$0xff]  ;;  %v63_v58 = vld [vmem:[#allocation2 + $0x110] sm:$0xff]  ;;  %v78_v62 = vld [vmem:[#allocation2 + $0x188] sm:$0xff]  ;;  %v106_v10 = vrot.slane %v28_v59, %v105_v0 }
  0x21   :  { %313 = vmatpush3.msra.mxu1 %v68_v35  ;;  %279 = vmatprep.subr.mxu0 %v51_v36  ;;  %v30_v1 = vld [vmem:[#allocation2 + $0x8] sm:$0xff]  ;;  %v45_v3 = vld [vmem:[#allocation2 + $0x80] sm:$0xff] }
  0x22   :  { %314 = vmatprep.subr.mxu1 %v83_v37  ;;  %280 = vmatpush3.msra.mxu0 %v35_v39  ;;  %v62_v2 = vld [vmem:[#allocation2 + $0x108] sm:$0xff]  ;;  %v77_v4 = vld [vmem:[#allocation2 + $0x180] sm:$0xff] }
  0x23   :  { %315 = vmatpush3.msra.mxu1 %v67_v40  ;;  %281 = vmatprep.subr.mxu0 %v50_v41  ;;  %v29_v6 = vld [vmem:[#allocation2] sm:$0xff] }
  0x24   :  { %316 = vmatprep.subr.mxu1 %v82_v42  ;;  %282 = vmatpush3.msra.mxu0 %v34_v43  ;;  %v61_v8 = vld [vmem:[#allocation2 + $0x100] sm:$0xff] }
  0x25   :  { %317 = vmatpush3.msra.mxu1 %v66_v44  ;;  %283 = vmatprep.subr.mxu0 %v49_v45  ;;  %v93_v13 = vld [vmem:[%s393_s2] sm:$0x1] }
  0x26   :  { %318 = vmatprep.subr.mxu1 %v81_v46  ;;  %284 = vmatpush3.msra.mxu0 %v33_v48 }
  0x27   :  { %319 = vmatpush3.msra.mxu1 %v65_v49  ;;  %285 = vmatprep.subr.mxu0 %v48_v50 }
  0x28   :  { %320 = vmatprep.subr.mxu1 %v80_v51  ;;  %286 = vmatpush3.msra.mxu0 %v32_v52 }
  0x29   :  { %321 = vmatpush3.msra.mxu1 %v64_v53  ;;  %287 = vmatprep.subr.mxu0 %v47_v54 }
  0x2a   :  { %322 = vmatprep.subr.mxu1 %v79_v55  ;;  %288 = vmatpush3.msra.mxu0 %v31_v57 }
  0x2b   :  { %323 = vmatpush3.msra.mxu1 %v63_v58  ;;  %289 = vmatprep.subr.mxu0 %v46_v61 }
  0x2c   :  { %324 = vmatprep.subr.mxu1 %v78_v62  ;;  %290 = vmatpush3.msra.mxu0 %v30_v1 }
  0x2d   :  { %325 = vmatpush3.msra.mxu1 %v62_v2  ;;  %291 = vmatprep.subr.mxu0 %v45_v3 }
  0x2e   :  { %326 = vmatprep.subr.mxu1 %v77_v4  ;;  %292 = vmatpush3.msra.mxu0 %v29_v6 }
  0x2f   :  { %179 = vmatprep.mubr.f32.mxu0 %v102_v5  ;;  %327 = vmatpush3.msra.mxu1 %v61_v8 }
  0x30   :  { %249 = vmatprep.mubr.f32.mxu1 %v110_v7  ;;  %180 = vmatmul.mubr.f32.vlgmr.msra.gmra.mxu0 %v98_v9 }
  0x31   :  { %250 = vmatmul.mubr.f32.vlgmr.msra.gmra.mxu1 %v106_v10 }
  0xf0   :  { %v293_v11 = vpop.f32.mrf.mxu0 }
  0xf1   :  { %v328_v12 = vpop.f32.mrf.mxu1 }
  0xf2   :  { %v294_v14 = vpop.f32.mrf.mxu0 }
  0xf3   :  { %v329_v15 = vpop.f32.mrf.mxu1  ;;  %v295_v16 = vadd.f32 %v294_v14, %v293_v11 }
  0xf4   :  { %v330_v18 = vadd.f32 %v329_v15, %v328_v12 }
  0xf5   :  { %v182_v17 = vadd.f32 %v295_v16, %v93_v13 }
  0xf7   :  { %v252_v19 = vadd.f32 %v330_v18, %v182_v17 }
  0xf9   :  { %255 = vst [vmem:[%s394_s3] sm:$0x1] %v252_v19 }
  0xfa   :  { %260 = vsyncpa [#allocation3], 1 }

</bundles_post_ra>
